<compile_context>
chip_gen: v5e
topology: v5e:2x2
jax: 0.10.0
libtpu: 0.0.40
codegen_flags: <defaults>
</compile_context>

<pallas_src>
import functools

import jax
import jax.numpy as jnp
from jax.experimental import pallas as pl
from jax.experimental.pallas import tpu as pltpu

_PAD_VAL = 1e8   # sentinel coordinate for padded points (never wins a min)
_STRIP = 8       # pred rows per inner-loop step (one f32 sublane group)


def _chamfer_kernel(pred_ref, target_ref, fwd_ref, bwd_ref, fwd_acc_ref):
    # pred_ref:    (TN, 3)   pred tile (rows = points, cols = xyz), resident over m
    # target_ref:  (3, TM)   target tile, lane-dense coordinate rows
    # fwd_ref:     (1, TN)   per-n-tile min over ALL target tiles (written at last m)
    # bwd_ref:     (1, TM)   per-(n, m) min over this pred tile
    # fwd_acc_ref: (TN, 1)   running row-min scratch, natural sublane orientation
    m_idx = pl.program_id(2)
    m_last = pl.num_programs(2) - 1

    tn = pred_ref.shape[0]
    tm = target_ref.shape[1]
    n_strips = tn // _STRIP

    # Start of a new m-sweep for this (b, n): reset the forward accumulator.
    @pl.when(m_idx == 0)
    def _():
        fwd_acc_ref[...] = jnp.full(fwd_acc_ref.shape, jnp.inf,
                                    dtype=fwd_acc_ref.dtype)

    # Target coordinate rows (and their sublane broadcast) are loop-invariant:
    # hoist them out of the strip loop.
    t = target_ref[...]                                        # (3, TM)
    t0 = jnp.broadcast_to(t[0:1, :], (_STRIP, tm))
    t1 = jnp.broadcast_to(t[1:2, :], (_STRIP, tm))
    t2 = jnp.broadcast_to(t[2:3, :], (_STRIP, tm))

    def strip_body(s, col_acc):
        start = pl.multiple_of(s * _STRIP, _STRIP)
        p = pred_ref[pl.ds(start, _STRIP), :]                  # (STRIP, 3)
        dx = p[:, 0:1] - t0
        dy = p[:, 1:2] - t1
        dz = p[:, 2:3] - t2
        d2 = dx * dx + dy * dy + dz * dz                       # (STRIP, TM) squared

        # Forward: fold the row-min over this target tile into the scratch.
        strip_min = jnp.min(d2, axis=1, keepdims=True)         # (STRIP, 1)
        prev = fwd_acc_ref[pl.ds(start, _STRIP), :]
        fwd_acc_ref[pl.ds(start, _STRIP), :] = jnp.minimum(prev, strip_min)

        # Backward: fold into the register-resident column-min carry.
        return jnp.minimum(col_acc, d2)

    col_init = jnp.full((_STRIP, tm), jnp.inf, dtype=jnp.float32)
    col_acc = jax.lax.fori_loop(0, n_strips, strip_body, col_init)

    # Per-(n, m) backward column min: lane-dense, unmasked store.
    bwd_ref[...] = jnp.min(col_acc, axis=0).reshape(1, tm)

    # Forward row min: single sublane->lane relayout + store per n tile.
    @pl.when(m_idx == m_last)
    def _():
        fwd_ref[...] = jnp.min(fwd_acc_ref[...], axis=1).reshape(1, tn)


def _round_up(x, m):
    return ((x + m - 1) // m) * m


def _pad_and_tile(n, max_tile, min_tiles=1):
    """(padded length, tile): tile % 128 == 0, padded % tile == 0, tile <= max_tile,
    every tile keeps at least one real point, and padded//tile >= min_tiles when
    that is feasible (used to keep both v7x TensorCores busy)."""
    max_tile = max(128, (max_tile // 128) * 128)
    tile = min(_round_up(n, 128), max_tile)
    if min_tiles > 1:
        tile = min(tile, max(128, _round_up(-(-n // min_tiles), 128)))
    n_pad = _round_up(n, tile)
    return n_pad, tile


@functools.partial(jax.jit, static_argnames=("max_tile_n", "max_tile_m"))
def chamfer_loss(pred, target, *, max_tile_n=1024, max_tile_m=1024):
    """Bidirectional Chamfer loss. pred: (B, N, 3), target: (B, M, 3)."""
    pred = pred.astype(jnp.float32)
    target = target.astype(jnp.float32)
    B, N, _ = pred.shape
    _, M, _ = target.shape

    # v7x has 2 TensorCores: when B == 1, split N so the parallel axes have >= 2 steps.
    min_n_tiles = 2 if B == 1 else 1
    N_pad, TN = _pad_and_tile(N, max_tile_n, min_tiles=min_n_tiles)
    M_pad, TM = _pad_and_tile(M, max_tile_m)
    n_tiles = N_pad // TN
    m_tiles = M_pad // TM

    # pred stays (B, N, 3): strip slices come straight off the sublane axis.
    pred_p = jnp.pad(pred, ((0, 0), (0, N_pad - N), (0, 0)),
                     constant_values=_PAD_VAL)
    # target transposed to (B, 3, M): lane-dense coordinate rows, dense DMA.
    target_t = jnp.pad(jnp.swapaxes(target, 1, 2),
                       ((0, 0), (0, 0), (0, M_pad - M)),
                       constant_values=_PAD_VAL)

    cost = pl.CostEstimate(
        flops=9 * B * n_tiles * TN * m_tiles * TM,
        transcendentals=0,
        bytes_accessed=4 * (B * N_pad * 3
                            + B * 3 * M_pad * n_tiles
                            + B * N_pad
                            + B * n_tiles * M_pad),
    )

    fwd_sq, bwd_sq = pl.pallas_call(
        _chamfer_kernel,
        out_shape=(
            jax.ShapeDtypeStruct((B, 1, N_pad), jnp.float32),
            jax.ShapeDtypeStruct((B, n_tiles, 1, M_pad), jnp.float32),
        ),
        grid=(B, n_tiles, m_tiles),
        in_specs=[
            pl.BlockSpec((None, TN, 3), lambda b, n, m: (b, n, 0)),
            pl.BlockSpec((None, 3, TM), lambda b, n, m: (b, 0, m)),
        ],
        out_specs=(
            pl.BlockSpec((None, 1, TN), lambda b, n, m: (b, 0, n)),
            pl.BlockSpec((None, None, 1, TM), lambda b, n, m: (b, n, 0, m)),
        ),
        scratch_shapes=[pltpu.VMEM((TN, 1), jnp.float32)],
        compiler_params=pltpu.CompilerParams(
            dimension_semantics=("parallel", "parallel", "arbitrary"),
        ),
        cost_estimate=cost,
    )(pred_p, target_t)

    # sqrt only on the reduced vectors (N + M elements), padding sliced out first.
    fwd = jnp.sqrt(fwd_sq[:, 0, :N])                               # (B, N)
    bwd = jnp.sqrt(jnp.min(bwd_sq[:, :, 0, :], axis=1)[:, :M])     # (B, M)
    return jnp.mean(fwd) + jnp.mean(bwd)


def _chamfer_ref(pred, target):
    diff = pred[:, :, None, :] - target[:, None, :, :]
    d = jnp.sqrt(jnp.sum(diff * diff, axis=-1))
    return jnp.mean(jnp.min(d, axis=2)) + jnp.mean(jnp.min(d, axis=1))


if __name__ == "__main__":
    key = jax.random.PRNGKey(0)
    k_pred, k_tgt, k_tgt2, k_big_p, k_big_t = jax.random.split(key, 5)

    B, N = 2, 64
    pred = jax.random.normal(k_pred, (B, N, 3), dtype=jnp.float32)
    target = jax.random.normal(k_tgt, (B, N, 3), dtype=jnp.float32)
    # Rectangular case (M != N, not a multiple of 128) to exercise padding.
    target_rect = jax.random.normal(k_tgt2, (B, 80, 3), dtype=jnp.float32)
    # Multi-tile case (B=1 forces 2 n tiles; small max_tile forces several m tiles)
    # to exercise the strip loop, scratch accumulation across m, and glue min over n.
    big_pred = jax.random.normal(k_big_p, (1, 300, 3), dtype=jnp.float32)
    big_tgt = jax.random.normal(k_big_t, (1, 260, 3), dtype=jnp.float32)

    # Matches the original usage: chamfer_loss(predicted, predicted) == 0.
    loss_self = jax.block_until_ready(chamfer_loss(pred, pred))
    loss_cross = jax.block_until_ready(chamfer_loss(pred, target))
    loss_rect = jax.block_until_ready(chamfer_loss(pred, target_rect))
    loss_big = jax.block_until_ready(
        chamfer_loss(big_pred, big_tgt, max_tile_n=128, max_tile_m=128))

    ref_self = _chamfer_ref(pred, pred)
    ref_cross = _chamfer_ref(pred, target)
    ref_rect = _chamfer_ref(pred, target_rect)
    ref_big = _chamfer_ref(big_pred, big_tgt)

    assert abs(float(loss_self) - float(ref_self)) < 1e-4, (loss_self, ref_self)
    assert abs(float(loss_cross) - float(ref_cross)) < 1e-4, (loss_cross, ref_cross)
    assert abs(float(loss_rect) - float(ref_rect)) < 1e-4, (loss_rect, ref_rect)
    assert abs(float(loss_big) - float(ref_big)) < 1e-4, (loss_big, ref_big)

    print("KERNEL_OK")
</pallas_src>

<mosaic_0001>
module attributes {stable_mosaic.version = 11 : i64} {
  func.func @_chamfer_kernel(%arg0: i32, %arg1: i32, %arg2: i32, %arg3: memref<1x128x3xf32, #tpu.memory_space<vmem>>, %arg4: memref<1x3x128xf32, #tpu.memory_space<vmem>>, %arg5: memref<1x1x128xf32, #tpu.memory_space<vmem>>, %arg6: memref<1x1x1x128xf32, #tpu.memory_space<vmem>>, %arg7: memref<128x1xf32, #tpu.memory_space<vmem>>) attributes {dimension_semantics = [#tpu.dimension_semantics<parallel>, #tpu.dimension_semantics<parallel>, #tpu.dimension_semantics<arbitrary>], iteration_bounds = array<i64: 2, 1, 1>, scalar_prefetch = 0 : i64, scratch_operands = 1 : i64, tpu.core_type = #tpu.core_type<tc>, window_params = [{transform_indices = @transform_0, window_bounds = array<i64: 1, 128, 3>}, {transform_indices = @transform_1, window_bounds = array<i64: 1, 3, 128>}, {transform_indices = @transform_2, window_bounds = array<i64: 1, 1, 128>}, {transform_indices = @transform_3, window_bounds = array<i64: 1, 1, 1, 128>}]} {
    %c0_i32 = arith.constant 0 : i32
    %0 = arith.cmpi eq, %arg2, %c0_i32 : i32
    %1 = arith.extui %0 : i1 to i32
    %c0_i32_0 = arith.constant 0 : i32
    %2 = arith.cmpi ne, %1, %c0_i32_0 : i32
    scf.if %2 {
      %cst_12 = arith.constant 0x7F800000 : f32
      %25 = vector.broadcast %cst_12 : f32 to vector<128x1xf32>
      %c0_13 = arith.constant 0 : index
      %c0_14 = arith.constant 0 : index
      %26 = vector.load %arg7[%c0_13, %c0_14] : memref<128x1xf32, #tpu.memory_space<vmem>>, vector<128x1xf32>
      tpu.vector_store %arg7[%c0_13, %c0_14], %25 {strides = array<i32>} : memref<128x1xf32, #tpu.memory_space<vmem>>, vector<128x1xf32>,
    } else {
    }
    %c0 = arith.constant 0 : index
    %c0_1 = arith.constant 0 : index
    %c0_2 = arith.constant 0 : index
    %3 = vector.load %arg4[%c0, %c0_1, %c0_2] : memref<1x3x128xf32, #tpu.memory_space<vmem>>, vector<1x3x128xf32>
    %4 = vector.shape_cast %3 : vector<1x3x128xf32> to vector<3x128xf32>
    %5 = vector.extract_strided_slice %4 {offsets = [0, 0], sizes = [1, 128], strides = [1, 1]} : vector<3x128xf32> to vector<1x128xf32>
    %6 = vector.shape_cast %5 : vector<1x128xf32> to vector<1x128xf32>
    %7 = vector.broadcast %6 : vector<1x128xf32> to vector<8x128xf32>
    %8 = vector.extract_strided_slice %4 {offsets = [1, 0], sizes = [1, 128], strides = [1, 1]} : vector<3x128xf32> to vector<1x128xf32>
    %9 = vector.shape_cast %8 : vector<1x128xf32> to vector<1x128xf32>
    %10 = vector.broadcast %9 : vector<1x128xf32> to vector<8x128xf32>
    %11 = vector.extract_strided_slice %4 {offsets = [2, 0], sizes = [1, 128], strides = [1, 1]} : vector<3x128xf32> to vector<1x128xf32>
    %12 = vector.shape_cast %11 : vector<1x128xf32> to vector<1x128xf32>
    %13 = vector.broadcast %12 : vector<1x128xf32> to vector<8x128xf32>
    %cst = arith.constant 0x7F800000 : f32
    %14 = vector.broadcast %cst : f32 to vector<8x128xf32>
    %c0_i32_3 = arith.constant 0 : i32
    %c16_i32 = arith.constant 16 : i32
    %15 = arith.addi %c0_i32_3, %c16_i32 : i32
    %c1_i32 = arith.constant 1 : i32
    %16 = scf.for %arg8 = %c0_i32_3 to %15 step %c1_i32 iter_args(%arg9 = %14) -> (vector<8x128xf32>)  : i32 {
      %c8_i32 = arith.constant 8 : i32
      %25 = arith.muli %arg8, %c8_i32 : i32
      %26 = tpu.assume_multiple %25, 8 : i32
      %c0_12 = arith.constant 0 : index
      %27 = arith.index_cast %26 : i32 to index
      %c0_13 = arith.constant 0 : index
      %28 = vector.load %arg3[%c0_12, %27, %c0_13] : memref<1x128x3xf32, #tpu.memory_space<vmem>>, vector<1x8x3xf32>
      %29 = vector.shape_cast %28 : vector<1x8x3xf32> to vector<8x3xf32>
      %30 = vector.extract_strided_slice %29 {offsets = [0, 0], sizes = [8, 1], strides = [1, 1]} : vector<8x3xf32> to vector<8x1xf32>
      %31 = vector.broadcast %30 : vector<8x1xf32> to vector<8x128xf32>
      %32 = arith.subf %31, %7 : vector<8x128xf32>
      %33 = vector.extract_strided_slice %29 {offsets = [0, 1], sizes = [8, 1], strides = [1, 1]} : vector<8x3xf32> to vector<8x1xf32>
      %34 = vector.broadcast %33 : vector<8x1xf32> to vector<8x128xf32>
      %35 = arith.subf %34, %10 : vector<8x128xf32>
      %36 = vector.extract_strided_slice %29 {offsets = [0, 2], sizes = [8, 1], strides = [1, 1]} : vector<8x3xf32> to vector<8x1xf32>
      %37 = vector.broadcast %36 : vector<8x1xf32> to vector<8x128xf32>
      %38 = arith.subf %37, %13 : vector<8x128xf32>
      %39 = arith.mulf %32, %32 : vector<8x128xf32>
      %40 = arith.mulf %35, %35 : vector<8x128xf32>
      %41 = arith.addf %39, %40 : vector<8x128xf32>
      %42 = arith.mulf %38, %38 : vector<8x128xf32>
      %43 = arith.addf %41, %42 : vector<8x128xf32>
      %cst_14 = arith.constant dense<0x7F800000> : vector<8xf32>
      %44 = vector.multi_reduction <minimumf>, %43, %cst_14 [1] : vector<8x128xf32> to vector<8xf32>
      %45 = vector.shape_cast %44 : vector<8xf32> to vector<8x1xf32>
      %46 = arith.index_cast %26 : i32 to index
      %c0_15 = arith.constant 0 : index
      %47 = vector.load %arg7[%46, %c0_15] : memref<128x1xf32, #tpu.memory_space<vmem>>, vector<8x1xf32>
      %48 = arith.minimumf %47, %45 : vector<8x1xf32>
      %49 = arith.index_cast %26 : i32 to index
      %c0_16 = arith.constant 0 : index
      %50 = vector.load %arg7[%49, %c0_16] : memref<128x1xf32, #tpu.memory_space<vmem>>, vector<8x1xf32>
      tpu.vector_store %arg7[%49, %c0_16], %48 {strides = array<i32>} : memref<128x1xf32, #tpu.memory_space<vmem>>, vector<8x1xf32>,
      %51 = arith.minimumf %arg9, %43 : vector<8x128xf32>
      scf.yield %51 : vector<8x128xf32>
    }
    %c16_i32_4 = arith.constant 16 : i32
    %cst_5 = arith.constant dense<0x7F800000> : vector<128xf32>
    %17 = vector.multi_reduction <minimumf>, %16, %cst_5 [0] : vector<8x128xf32> to vector<128xf32>
    %18 = vector.shape_cast %17 : vector<128xf32> to vector<1x128xf32>
    %c0_6 = arith.constant 0 : index
    %c0_7 = arith.constant 0 : index
    %c0_8 = arith.constant 0 : index
    %c0_9 = arith.constant 0 : index
    %19 = vector.load %arg6[%c0_6, %c0_7, %c0_8, %c0_9] : memref<1x1x1x128xf32, #tpu.memory_space<vmem>>, vector<1x1x1x128xf32>
    %20 = vector.shape_cast %19 : vector<1x1x1x128xf32> to vector<1x128xf32>
    %21 = vector.shape_cast %18 : vector<1x128xf32> to vector<1x1x1x128xf32>
    tpu.vector_store %arg6[%c0_6, %c0_7, %c0_8, %c0_9], %21 {strides = array<i32>} : memref<1x1x1x128xf32, #tpu.memory_space<vmem>>, vector<1x1x1x128xf32>,
    %c0_i32_10 = arith.constant 0 : i32
    %22 = arith.cmpi eq, %arg2, %c0_i32_10 : i32
    %23 = arith.extui %22 : i1 to i32
    %c0_i32_11 = arith.constant 0 : i32
    %24 = arith.cmpi ne, %23, %c0_i32_11 : i32
    scf.if %24 {
      %c0_12 = arith.constant 0 : index
      %c0_13 = arith.constant 0 : index
      %25 = vector.load %arg7[%c0_12, %c0_13] : memref<128x1xf32, #tpu.memory_space<vmem>>, vector<128x1xf32>
      %cst_14 = arith.constant dense<0x7F800000> : vector<128xf32>
      %26 = vector.multi_reduction <minimumf>, %25, %cst_14 [1] : vector<128x1xf32> to vector<128xf32>
      %27 = vector.shape_cast %26 : vector<128xf32> to vector<1x128xf32>
      %c0_15 = arith.constant 0 : index
      %c0_16 = arith.constant 0 : index
      %c0_17 = arith.constant 0 : index
      %28 = vector.load %arg5[%c0_15, %c0_16, %c0_17] : memref<1x1x128xf32, #tpu.memory_space<vmem>>, vector<1x1x128xf32>
      %29 = vector.shape_cast %28 : vector<1x1x128xf32> to vector<1x128xf32>
      %30 = vector.shape_cast %27 : vector<1x128xf32> to vector<1x1x128xf32>
      tpu.vector_store %arg5[%c0_15, %c0_16, %c0_17], %30 {strides = array<i32>} : memref<1x1x128xf32, #tpu.memory_space<vmem>>, vector<1x1x128xf32>,
    } else {
    }
    return
  }
  func.func @transform_0(%arg0: i32, %arg1: i32, %arg2: i32) -> (i32, i32, i32) {
    %c0_i32 = arith.constant 0 : i32
    %c0_i32_0 = arith.constant 0 : i32
    return %arg0, %arg1, %c0_i32 : i32, i32, i32
  }
  func.func @transform_1(%arg0: i32, %arg1: i32, %arg2: i32) -> (i32, i32, i32) {
    %c0_i32 = arith.constant 0 : i32
    %c0_i32_0 = arith.constant 0 : i32
    return %arg0, %c0_i32, %arg2 : i32, i32, i32
  }
  func.func @transform_2(%arg0: i32, %arg1: i32, %arg2: i32) -> (i32, i32, i32) {
    %c0_i32 = arith.constant 0 : i32
    %c0_i32_0 = arith.constant 0 : i32
    return %arg0, %c0_i32, %arg1 : i32, i32, i32
  }
  func.func @transform_3(%arg0: i32, %arg1: i32, %arg2: i32) -> (i32, i32, i32, i32) {
    %c0_i32 = arith.constant 0 : i32
    %c0_i32_0 = arith.constant 0 : i32
    return %arg0, %arg1, %c0_i32, %arg2 : i32, i32, i32, i32
  }
}

</mosaic_0001>

<bundles_post_ra>
// kernel: chamfer_loss.1
= control target key start
LH: loop header
LB: loop body
LE: loop exit
PB: predicated region body
PF: predicated region fallthrough
CT: control target
= control target key end

     0   :  { %s757_s12 = smov 0   ;;  %s759_s13 = smov 0   ;;  %s859_s0 = inlined_call_operand.vmem [shape: f32[2,128,3], index: 0, kind: input, shape index: {}]   ;;  %s860_s1 = inlined_call_operand.vmem [shape: f32[2,3,128], index: 1, kind: input, shape index: {}]   ;;  %s861_s2 = inlined_call_operand.vmem [shape: f32[2,1,128], index: 2, kind: output, shape index: {0}]   ;;  %s862_s3 = inlined_call_operand.vmem [shape: f32[2,1,1,128], index: 3, kind: output, shape index: {1}]  }
   0x1   :  { %s761_s14 = smov 0  }
   0x2 LB: > { %s33_s15 = sadd.s32 1, %s718_s13  ;;  %p632_p0 = scmp.ge.s32.totalorder %s722_s14, 1  ;;  %s722_s14 = sphi %s761_s14, %s14_s14   ;;  %s718_s13 = sphi %s759_s13, %s864_s13   ;;  %s714_s12 = sphi %s757_s12, %s863_s12  }
   0x3   : > { %p35_p1 = scmp.ge.s32.totalorder %s33_s15, 2  ;;  %p186_p2 = scmp.lt.s32.totalorder %s722_s14, 3 }
   0x5   : > { %s866_s15 = smov (%p35_p1, %s33_s15), 0  ;;  %p187_p3 = pnand %p632_p0, %p186_p2 }
   0x6   : > { %p232_p4 = scmp.lt.s32.totalorder (!%p187_p3), %s714_s12, 1  ;;  %s811_s30 = smov (!%p187_p3), 0  }
   0x7   : > { %190 = sbr.rel (%p187_p3) target bundleno = 450 (0x1c2), region = 28 }
   0xc   : > { %vm267_vm0 = vcmask 7168   ;;  %v732_v0 = vmov inf   ;;  %s868_s12 = smov (!%p232_p4, %s714_s12), 1  ;;  %v724_v5 = vmov inf  }
   0xd   : > { %268 = vst.msk [vmem:[#allocation2] sm:$0xff] %vm267_vm0, %v732_v0  ;;  %s639_s16 = sshll.u32 %s868_s12, 7  ;;  %s635_s17 = sshll.u32 %s868_s12, 2 }
   0xe   : > { %269 = vst.msk [vmem:[#allocation2 + $0x8] sm:$0xff] %vm267_vm0, %v732_v0  ;;  %s786_s20 = scalar_lea.vmem %s859_s0, %s639_s16  ;;  %s247_s23 = scalar_lea.vmem %s860_s1, %s635_s17 }
   0xf   : > { %270 = vst.msk [vmem:[#allocation2 + $0x10] sm:$0xff] %vm267_vm0, %v732_v0  ;;  %s253_s26 = scalar_lea.vmem %s861_s2, %s868_s12  ;;  %s262_s29 = scalar_lea.vmem %s862_s3, %s868_s12  ;;  %v284_v1 = vld [vmem:[%s247_s23] sm:$0x7] }
  0x10   : > { %271 = vst.msk [vmem:[#allocation2 + $0x18] sm:$0xff] %vm267_vm0, %v732_v0  ;;  %v285_v2 = vperm.slane %v284_v1, 0  ;;  %v286_v3 = vperm.slane %v284_v1, 1  ;;  %v287_v4 = vperm.slane %v284_v1, 2 }
  0x11   : > { %272 = vst.msk [vmem:[#allocation2 + $0x20] sm:$0xff] %vm267_vm0, %v732_v0 }
  0x12   : > { %273 = vst.msk [vmem:[#allocation2 + $0x28] sm:$0xff] %vm267_vm0, %v732_v0 }
  0x13   : > { %274 = vst.msk [vmem:[#allocation2 + $0x30] sm:$0xff] %vm267_vm0, %v732_v0 }
  0x14   : > { %275 = vst.msk [vmem:[#allocation2 + $0x38] sm:$0xff] %vm267_vm0, %v732_v0 }
  0x15   : > { %276 = vst.msk [vmem:[#allocation2 + $0x40] sm:$0xff] %vm267_vm0, %v732_v0 }
  0x16   : > { %277 = vst.msk [vmem:[#allocation2 + $0x48] sm:$0xff] %vm267_vm0, %v732_v0 }
  0x17   : > { %278 = vst.msk [vmem:[#allocation2 + $0x50] sm:$0xff] %vm267_vm0, %v732_v0 }
  0x18   : > { %279 = vst.msk [vmem:[#allocation2 + $0x58] sm:$0xff] %vm267_vm0, %v732_v0 }
  0x19   : > { %280 = vst.msk [vmem:[#allocation2 + $0x60] sm:$0xff] %vm267_vm0, %v732_v0 }
  0x1a   : > { %281 = vst.msk [vmem:[#allocation2 + $0x68] sm:$0xff] %vm267_vm0, %v732_v0 }
  0x1b   : > { %282 = vst.msk [vmem:[#allocation2 + $0x70] sm:$0xff] %vm267_vm0, %v732_v0 }
  0x1c   : > { %283 = vst.msk [vmem:[#allocation2 + $0x78] sm:$0xff] %vm267_vm0, %v732_v0 }
  0x1d LB: >> { %v733_v6 = vmov 0   ;;  %v734_v7 = vmov 2   ;;  %s636_s4 = sshll.u32 %s730_s30, 3  ;;  %v735_v9 = vmov 1   ;;  %s293_s30 = sadd.s32 1, %s730_s30   ;;  %s730_s30 = sphi %s811_s30, %s293_s30   ;;  %v726_v5 = vphi %v724_v5, %v725_v5  }
  0x1e   : >> { %685 = vset.pattern.permute.xlu0 %v733_v6  ;;  %687 = vset.pattern.permute.xlu1 %v734_v7  ;;  %s296_s5 = scalar_lea.vmem %s786_s20, %s636_s4  ;;  %s321_s6 = scalar_lea.vmem [#allocation2], %s636_s4 }
  0x1f   : >> { %v297_v8 = vld [vmem:[%s296_s5] sm:$0xff]  ;;  %p290_p5 = scmp.ge.s32.totalorder %s293_s30, 16  }
  0x20   : >> { %300 = vperm.xlu0 %685, %v297_v8   ;;  %310 = vperm.xlu1 %687, %v297_v8   ;;  %v736_v28 = vmov (%p290_p5), 0   ;;  %v417_v43 = vlaneseq (%p290_p5)  ;;  %vm422_vm1 = vcmask (%p290_p5), 130112   ;;  %vm426_vm2 = vcmask (%p290_p5), 195712  }
  0x21   : > { %691 = vset.pattern.permute.xlu2 (%p290_p5), %v736_v28  ;;  %vm430_vm3 = vcmask (%p290_p5), 261312   ;;  %vm434_vm4 = vcmask (%p290_p5), 326912   ;;  %vm438_vm5 = vcmask (%p290_p5), 392512   ;;  %vm442_vm6 = vcmask (%p290_p5), 458112  }
  0x22   : > { %v822_v48 = vand.u32 (%p290_p5), 127, %v417_v43  ;;  %vm446_vm7 = vcmask (%p290_p5), 523712   ;;  %vm450_vm8 = vcmask (%p290_p5), 589312   ;;  %vm454_vm9 = vcmask (%p290_p5), 654912  }
  0x23   : >> { %v322_v22 = vld [vmem:[%s321_s6] sm:$0xff]  ;;  %vm458_vm10 = vcmask (%p290_p5), 720512   ;;  %vm462_vm11 = vcmask (%p290_p5), 786112   ;;  %vm466_vm12 = vcmask (%p290_p5), 851712   ;;  %vm470_vm13 = vcmask (%p290_p5), 917312  }
  0x24   : > { %v420_v50 = vadd.s32 (%p290_p5), 4294967288, %v822_v48  ;;  %v424_v51 = vadd.s32 (%p290_p5), 4294967280, %v822_v48  ;;  %v428_v58 = vadd.s32 (%p290_p5), 4294967272, %v822_v48  ;;  %v432_v63 = vadd.s32 (%p290_p5), 4294967264, %v822_v48 }
  0x25   : > { %vm474_vm14 = vcmask (%p290_p5), 982912   ;;  %vm478_vm15 = vcmask (%p290_p5), 1048512  }
  0x28   : >> { %686 = vset.pattern.permute.xlu0 %v735_v9  ;;  %690 = vset.pattern.permute.xlu1 (%p290_p5), %v736_v28  ;;  %v444_v9 = vadd.s32 (%p290_p5), 4294967240, %v822_v48 }
  0x29   : >> { %305 = vperm.xlu0 %686, %v297_v8  }
  0x31   : >> { %688 = vset.pattern.permute.xlu0 %v734_v7 }
  0x32   : > { %689 = vset.pattern.permute.xlu0 (%p290_p5), %v736_v28 }
  0x92   : >> { %v301_v10 = vpop.permute.xlu0 %300  ;;  %v311_v11 = vpop.permute.xlu1 %310 }
  0x93   : >> { %v303_v12 = vsub.f32 %v301_v10, %v285_v2  ;;  %v313_v13 = vsub.f32 %v311_v11, %v287_v4  ;;  %v440_v2 = vadd.s32 (%p290_p5), 4294967248, %v822_v48 }
  0x95   : >> { %v314_v16 = vmul.f32 %v303_v12, %v303_v12  ;;  %v317_v18 = vmul.f32 %v313_v13, %v313_v13 }
  0x9b   : >> { %v306_v14 = vpop.permute.xlu0 %305 }
  0x9c   : >> { %v308_v15 = vsub.f32 %v306_v14, %v286_v3  ;;  %v436_v3 = vadd.s32 (%p290_p5), 4294967256, %v822_v48 }
  0x9e   : >> { %v315_v17 = vmul.f32 %v308_v15, %v308_v15  ;;  %v452_v15 = vadd.s32 (%p290_p5), 4294967224, %v822_v48 }
  0xa0   : >> { %v316_v19 = vadd.f32 %v315_v17, %v314_v16  ;;  %v448_v16 = vadd.s32 (%p290_p5), 4294967232, %v822_v48 }
  0xa2   : >> { %v318_v20 = vadd.f32 %v317_v18, %v316_v19  ;;  %v456_v18 = vadd.s32 (%p290_p5), 4294967216, %v822_v48 }
  0xa4   : >> { %319 = vmin.xlane.f32.xlu1 %v318_v20  ;;  %v326_v21 = vmin.f32 %v726_v5, %v318_v20  }
  0xa6   : >> { %v725_v5 = vmov %v326_v21   ;;  %v327_v46 = vrot.slane (%p290_p5), %v326_v21, 4 }
  0xa8   : > { %v328_v47 = vmin.f32 (%p290_p5), %v326_v21, %v327_v46 }
  0xaa   : > { %v329_v49 = vrot.slane (%p290_p5), %v328_v47, 2 }
  0xac   : > { %v330_v52 = vmin.f32 (%p290_p5), %v328_v47, %v329_v49 }
  0xae   : > { %v331_v56 = vrot.slane (%p290_p5), %v330_v52, 1 }
  0xb0   : > { %v332_v61 = vmin.f32 (%p290_p5), %v330_v52, %v331_v56 }
  0xb2   : > { %333 = vst [vmem:[%s262_s29] sm:$0x1] (%p290_p5), %v332_v61 }
 0x116   : > { %292 = sbr.rel (!%p290_p5) target bundleno = 29 (0x1d), region = 90 }
 0x117   : >> { %v320_v23 = vpop.xlane.xlu1 %319 }
 0x118   : >> { %v323_v24 = vmin.f32 %v322_v22, %v320_v23 }
 0x11a   : >> { %325 = vst.msk [vmem:[%s321_s6] sm:$0xff] %vm267_vm0, %v323_v24 }
 0x121   : > { %v341_v25 = vld [vmem:[#allocation2 + $0x20] sm:$0xff]  ;;  %v339_v26 = vld [vmem:[#allocation2 + $0x10] sm:$0xff]  ;;  %v342_v29 = vld [vmem:[#allocation2 + $0x28] sm:$0xff] }
 0x122   : > { %v337_v27 = vld [vmem:[#allocation2] sm:$0xff]  ;;  %382 = vperm.xlu2 %691, %v341_v25   ;;  %376 = vperm.xlu1 %690, %v339_v26   ;;  %v340_v30 = vld [vmem:[#allocation2 + $0x18] sm:$0xff]  ;;  %v338_v31 = vld [vmem:[#allocation2 + $0x8] sm:$0xff] }
 0x123   : > { %370 = vperm.xlu0 %689, %v337_v27   ;;  %v345_v32 = vld [vmem:[#allocation2 + $0x40] sm:$0xff]  ;;  %v344_v33 = vld [vmem:[#allocation2 + $0x38] sm:$0xff]  ;;  %v343_v34 = vld [vmem:[#allocation2 + $0x30] sm:$0xff]  ;;  %v460_v27 = vadd.s32 4294967208, %v822_v48 }
 0x124   : > { %v348_v35 = vld [vmem:[#allocation2 + $0x58] sm:$0xff]  ;;  %v347_v36 = vld [vmem:[#allocation2 + $0x50] sm:$0xff]  ;;  %v346_v37 = vld [vmem:[#allocation2 + $0x48] sm:$0xff] }
 0x125   : > { %v351_v38 = vld [vmem:[#allocation2 + $0x70] sm:$0xff]  ;;  %v350_v39 = vld [vmem:[#allocation2 + $0x68] sm:$0xff]  ;;  %v349_v40 = vld [vmem:[#allocation2 + $0x60] sm:$0xff] }
 0x126   : > { %v352_v41 = vld [vmem:[#allocation2 + $0x78] sm:$0xff] }
 0x12a   : > { %385 = vperm.xlu2 %691, %v342_v29   ;;  %379 = vperm.xlu1 %690, %v340_v30   ;;  %v464_v29 = vadd.s32 4294967200, %v822_v48  ;;  %v468_v30 = vadd.s32 4294967192, %v822_v48 }
 0x12b   : > { %373 = vperm.xlu0 %689, %v338_v31  }
 0x132   : > { %394 = vperm.xlu2 %691, %v345_v32   ;;  %391 = vperm.xlu1 %690, %v344_v33  }
 0x133   : > { %388 = vperm.xlu0 %689, %v343_v34  }
 0x13a   : > { %403 = vperm.xlu2 %691, %v348_v35   ;;  %400 = vperm.xlu1 %690, %v347_v36  }
 0x13b   : > { %397 = vperm.xlu0 %689, %v346_v37  }
 0x142   : > { %412 = vperm.xlu2 %691, %v351_v38   ;;  %409 = vperm.xlu1 %690, %v350_v39   ;;  %v472_v38 = vadd.s32 4294967184, %v822_v48 }
 0x143   : > { %406 = vperm.xlu0 %689, %v349_v40  }
 0x14b   : > { %415 = vperm.xlu0 %689, %v352_v41   ;;  %v476_v41 = vadd.s32 4294967176, %v822_v48 }
 0x17c   : > { %v383_v42 = vpop.permute.xlu2 %382 }
 0x17d   : > { %v433_v5 = vperm.slane %v383_v42, %v432_v63 }
 0x184   : > { %v386_v53 = vpop.permute.xlu2 %385 }
 0x185   : > { %v437_v12 = vperm.slane %v386_v53, %v436_v3 }
 0x18c   : > { %v395_v8 = vpop.permute.xlu2 %394 }
 0x18d   : > { %v449_v23 = vperm.slane %v395_v8, %v448_v16 }
 0x194   : > { %v377_v44 = vpop.permute.xlu1 %376  ;;  %v404_v24 = vpop.permute.xlu2 %403 }
 0x195   : > { %v371_v45 = vpop.permute.xlu0 %370  ;;  %v425_v60 = vperm.slane %v377_v44, %v424_v51  ;;  %v461_v34 = vperm.slane %v404_v24, %v460_v27 }
 0x196   : > { %v419_v57 = vperm.slane %v371_v45, %v822_v48 }
 0x19c   : > { %v380_v54 = vpop.permute.xlu1 %379  ;;  %v413_v40 = vpop.permute.xlu2 %412 }
 0x19d   : > { %v374_v55 = vpop.permute.xlu0 %373  ;;  %v429_v1 = vperm.slane %v380_v54, %v428_v58  ;;  %v473_v43 = vperm.slane %v413_v40, %v472_v38 }
 0x19e   : > { %v421_v59 = vperm.slane %v374_v55, %v420_v50 }
 0x1a0   : > { %v423_v62 = vsel %vm422_vm1, %v421_v59, %v419_v57 }
 0x1a1   : > { %v427_v0 = vsel %vm426_vm2, %v425_v60, %v423_v62 }
 0x1a2   : > { %v431_v4 = vsel %vm430_vm3, %v429_v1, %v427_v0 }
 0x1a3   : > { %v435_v10 = vsel %vm434_vm4, %v433_v5, %v431_v4 }
 0x1a4   : > { %v392_v6 = vpop.permute.xlu1 %391  ;;  %v439_v14 = vsel %vm438_vm5, %v437_v12, %v435_v10 }
 0x1a5   : > { %v389_v7 = vpop.permute.xlu0 %388  ;;  %v445_v13 = vperm.slane %v392_v6, %v444_v9 }
 0x1a6   : > { %v441_v11 = vperm.slane %v389_v7, %v440_v2 }
 0x1a8   : > { %v443_v17 = vsel %vm442_vm6, %v441_v11, %v439_v14 }
 0x1a9   : > { %v447_v21 = vsel %vm446_vm7, %v445_v13, %v443_v17 }
 0x1aa   : > { %v451_v26 = vsel %vm450_vm8, %v449_v23, %v447_v21 }
 0x1ac   : > { %v401_v19 = vpop.permute.xlu1 %400 }
 0x1ad   : > { %v398_v20 = vpop.permute.xlu0 %397  ;;  %v457_v25 = vperm.slane %v401_v19, %v456_v18 }
 0x1ae   : > { %v453_v22 = vperm.slane %v398_v20, %v452_v15 }
 0x1b0   : > { %v455_v28 = vsel %vm454_vm9, %v453_v22, %v451_v26 }
 0x1b1   : > { %v459_v31 = vsel %vm458_vm10, %v457_v25, %v455_v28 }
 0x1b2   : > { %v463_v37 = vsel %vm462_vm11, %v461_v34, %v459_v31 }
 0x1b4   : > { %v410_v32 = vpop.permute.xlu1 %409 }
 0x1b5   : > { %v407_v33 = vpop.permute.xlu0 %406  ;;  %v469_v36 = vperm.slane %v410_v32, %v468_v30 }
 0x1b6   : > { %v465_v35 = vperm.slane %v407_v33, %v464_v29 }
 0x1b8   : > { %v467_v39 = vsel %vm466_vm12, %v465_v35, %v463_v37 }
 0x1b9   : > { %v471_v42 = vsel %vm470_vm13, %v469_v36, %v467_v39 }
 0x1ba   : > { %v475_v46 = vsel %vm474_vm14, %v473_v43, %v471_v42 }
 0x1bd   : > { %v416_v44 = vpop.permute.xlu0 %415 }
 0x1be   : > { %v477_v45 = vperm.slane %v416_v44, %v476_v41 }
 0x1c0   : > { %v479_v47 = vsel %vm478_vm15, %v477_v45, %v475_v46 }
 0x1c1   : > { %481 = vst [vmem:[%s253_s26] sm:$0x1] %v479_v47 }
 0x1c2 PF: > { %s14_s14 = sadd.s32 1, %s722_s14   ;;  %s863_s12 = smov %s718_s13 }
 0x1c3   : > { %p11_p6 = scmp.ge.s32.totalorder %s14_s14, 4   ;;  %s864_s13 = smov %s866_s15 }
 0x1c5   :  { %13 = sbr.rel (!%p11_p6) target bundleno = 2 (0x2), region = 101 }

</bundles_post_ra>
